<compile_context>
chip_gen: v7x
topology: tpu7x:2x2x1
jax: 0.10.0
libtpu: 0.0.40
codegen_flags: <defaults>
</compile_context>

<pallas_src>
import jax
import jax.numpy as jnp
from jax.experimental import pallas as pl
from jax.experimental.pallas import tpu as pltpu

# ----- AdaptiveNeuron hyper-parameters (the `params` dict), fixed deterministically -----
BETA = 0.9                          # params['BETA']
FACTOR = (1.0 - BETA ** 2) ** 0.5   # params['1-beta'] == 'improved'
ADAPDECAY = 0.95                    # params['ADAPDECAY']
ADAPSCALE = 0.3                     # params['ADAPSCALE']

# ----- deterministic architecture (layer -> (input sources, neuron size)) -----
# Every layer has a Linear synapse (params[2] truthy), the common configuration;
# a synapse-less layer would reuse the pure-elementwise neuron kernel instead.
IN_SIZE = 40
ARCHITECTURE = {
    "hidden": (("input", "hidden"), 64),   # recurrent hidden layer
    "output": (("hidden",), 48),
}


def _round_up(x, m):
    return ((x + m - 1) // m) * m


def _pick_tile(dim, max_tile):
    """Largest multiple of 128 (<= max_tile) that divides dim (dim is a 128-multiple)."""
    for t in range(max_tile, 127, -128):
        if dim % t == 0:
            return t
    return 128


def _pad2(a, rows, cols):
    return jnp.pad(a, ((0, rows - a.shape[0]), (0, cols - a.shape[1])))


# --------------------------------------------------------------------------------------
# Fused Linear-synapse + AdaptiveNeuron kernel
# --------------------------------------------------------------------------------------
def fused_synapse_neuron_kernel(x_ref, w_ref, b_ref, mem_ref, spk_ref, rel_ref,
                                spk_out_ref, mem_out_ref, rel_out_ref, acc_ref):
    k = pl.program_id(1)

    @pl.when(k == 0)
    def _init():
        acc_ref[...] = jnp.zeros_like(acc_ref)

    acc_ref[...] += jnp.dot(x_ref[...], w_ref[...],
                            preferred_element_type=jnp.float32)

    @pl.when(k == pl.num_programs(1) - 1)
    def _epilogue():
        x = acc_ref[...] + b_ref[...]          # synapse output (bias broadcast over batch)
        mem = mem_ref[...]
        spk = spk_ref[...]
        rel = rel_ref[...]

        new_rel = ADAPDECAY * rel + (1.0 - ADAPDECAY) * spk
        thr = 1.0 + new_rel * ADAPSCALE
        new_mem = BETA * mem + FACTOR * x - spk * thr
        # PyTorch: ((old_mem - thr) / thr > 0).  thr >= 1 here (spikes in {0,1},
        # rel_thresh >= 0), so the division never changes the sign.
        new_spk = (mem > thr).astype(jnp.float32)

        spk_out_ref[...] = new_spk
        mem_out_ref[...] = new_mem
        rel_out_ref[...] = new_rel


def fused_synapse_neuron(x, w, b, mem, spikes, rel_thresh,
                         *, max_tile_n=512, max_tile_k=512):
    """x:[B,K], w:[K,N], b:[N], mem/spikes/rel_thresh:[B,N] -> (new_spk, new_mem, new_rel)."""
    B, K = x.shape
    N = w.shape[1]
    Bp = _round_up(B, 8)          # sublane-aligned batch
    Kp = _round_up(K, 128)        # lane-dense reduction dim
    Np = _round_up(N, 128)        # lane-dense output dim
    tk = _pick_tile(Kp, max_tile_k)
    tn = _pick_tile(Np, max_tile_n)

    xp = _pad2(x, Bp, Kp)
    wp = _pad2(w, Kp, Np)
    bp = jnp.pad(b, (0, Np - N)).reshape(1, Np)
    memp = _pad2(mem, Bp, Np)
    spkp = _pad2(spikes, Bp, Np)
    relp = _pad2(rel_thresh, Bp, Np)

    state_spec = pl.BlockSpec((Bp, tn), lambda n, k: (0, n))
    out_shape = jax.ShapeDtypeStruct((Bp, Np), jnp.float32)

    new_spk, new_mem, new_rel = pl.pallas_call(
        fused_synapse_neuron_kernel,
        out_shape=(out_shape, out_shape, out_shape),
        grid_spec=pltpu.PrefetchScalarGridSpec(
            num_scalar_prefetch=0,
            grid=(Np // tn, Kp // tk),
            in_specs=[
                pl.BlockSpec((Bp, tk), lambda n, k: (0, k)),   # x
                pl.BlockSpec((tk, tn), lambda n, k: (k, n)),   # W
                pl.BlockSpec((1, tn), lambda n, k: (0, n)),    # bias
                state_spec,                                    # mem
                state_spec,                                    # spikes
                state_spec,                                    # rel_thresh
            ],
            out_specs=(state_spec, state_spec, state_spec),
            scratch_shapes=[pltpu.VMEM((Bp, tn), jnp.float32)],
        ),
        # update the recurrent state in place: mem->mem_out, spikes->spk_out, rel->rel_out
        input_output_aliases={3: 1, 4: 0, 5: 2},
        compiler_params=pltpu.CompilerParams(
            dimension_semantics=("parallel", "arbitrary")),
    )(xp, wp, bp, memp, spkp, relp)

    return new_spk[:B, :N], new_mem[:B, :N], new_rel[:B, :N]


# --------------------------------------------------------------------------------------
# ParallelNetwork forward (one timestep), built from the fused per-layer kernel
# --------------------------------------------------------------------------------------
def network_forward(inp, params, state, spikes):
    """Mirror of ParallelNetwork.forward(inp, h) with h = (state, spikes)."""
    l_inputs = dict(spikes)            # OLD spikes, read before any update (as in PyTorch)
    l_inputs["input"] = inp
    new_state = {}
    new_spikes = {}
    for layer, (srcs, _) in ARCHITECTURE.items():
        xs = [l_inputs[s] for s in srcs]
        x = jnp.concatenate(xs, axis=-1) if len(xs) > 1 else xs[0]
        w, b = params[layer]
        st = state[layer]
        n_spk, n_mem, n_rel = fused_synapse_neuron(
            x, w, b, st["mem"], st["spikes"], st["rel_thresh"])
        new_spikes[layer] = n_spk
        new_state[layer] = {"mem": n_mem, "spikes": n_spk, "rel_thresh": n_rel}
    # TODO(synk): a multi-timestep variant would fuse the T-loop into one pallas_call
    # with the state resident in VMEM; this implements the module's single-step forward.
    return new_spikes["output"], (new_state, new_spikes)


def get_initial_state(batch_size):
    """Mirror of ParallelNetwork.get_initial_state (plain JAX glue)."""
    state, spikes = {}, {}
    for layer, (_, size) in ARCHITECTURE.items():
        mem = jnp.zeros((batch_size, size), jnp.float32)
        spk = (mem - 1.0 > 0.0).astype(jnp.float32)
        state[layer] = {"mem": mem, "spikes": spk, "rel_thresh": jnp.zeros_like(mem)}
        spikes[layer] = spk
    return state, spikes


def reference_forward(inp, params, state, spikes):
    """Pure-jnp reference with the exact PyTorch math (including the division)."""
    l_inputs = dict(spikes)
    l_inputs["input"] = inp
    new_state, new_spikes = {}, {}
    for layer, (srcs, _) in ARCHITECTURE.items():
        xs = [l_inputs[s] for s in srcs]
        x = jnp.concatenate(xs, axis=-1) if len(xs) > 1 else xs[0]
        w, b = params[layer]
        x = x @ w + b
        st = state[layer]
        new_rel = ADAPDECAY * st["rel_thresh"] + (1.0 - ADAPDECAY) * st["spikes"]
        thr = 1.0 + new_rel * ADAPSCALE
        new_mem = BETA * st["mem"] + FACTOR * x - st["spikes"] * thr
        new_spk = ((st["mem"] - thr) / thr > 0.0).astype(jnp.float32)
        new_spikes[layer] = new_spk
        new_state[layer] = {"mem": new_mem, "spikes": new_spk, "rel_thresh": new_rel}
    return new_spikes["output"], (new_state, new_spikes)


if __name__ == "__main__":
    B = 2
    key = jax.random.PRNGKey(0)
    k_inp, k_par, k_state = jax.random.split(key, 3)

    inp = jax.random.normal(k_inp, (B, IN_SIZE), jnp.float32)

    # Deterministic synapse parameters (Linear(concat_size, layer_size, bias=True)).
    params = {}
    pkeys = jax.random.split(k_par, len(ARCHITECTURE))
    for pk, (layer, (srcs, size)) in zip(pkeys, ARCHITECTURE.items()):
        fan_in = sum(IN_SIZE if s == "input" else ARCHITECTURE[s][1] for s in srcs)
        kw, kb = jax.random.split(pk)
        w = jax.random.normal(kw, (fan_in, size), jnp.float32) / jnp.sqrt(float(fan_in))
        b = 0.1 * jax.random.normal(kb, (size,), jnp.float32)
        params[layer] = (w, b)

    # Start from the module's initial state, then give it deterministic non-trivial values.
    state, spikes = get_initial_state(B)
    skeys = jax.random.split(k_state, 3 * len(ARCHITECTURE))
    for i, (layer, (_, size)) in enumerate(ARCHITECTURE.items()):
        km, ks, kr = skeys[3 * i], skeys[3 * i + 1], skeys[3 * i + 2]
        mem = jax.random.normal(km, (B, size), jnp.float32)
        spk = (jax.random.uniform(ks, (B, size)) > 0.5).astype(jnp.float32)
        rel = 0.1 * jax.random.uniform(kr, (B, size), jnp.float32)
        state[layer] = {"mem": mem, "spikes": spk, "rel_thresh": rel}
        spikes[layer] = spk

    fwd = jax.jit(network_forward)
    out_spk, (new_state, new_spikes) = fwd(inp, params, state, spikes)
    jax.block_until_ready((out_spk, new_state, new_spikes))

    # ---- correctness check against the pure-jnp reference ----
    ref_out, (ref_state, ref_spikes) = reference_forward(inp, params, state, spikes)

    assert jnp.array_equal(out_spk, ref_out)
    for layer in ARCHITECTURE:
        assert jnp.array_equal(new_spikes[layer], ref_spikes[layer])
        assert jnp.allclose(new_state[layer]["mem"], ref_state[layer]["mem"],
                            atol=1e-4, rtol=1e-5)
        assert jnp.allclose(new_state[layer]["rel_thresh"],
                            ref_state[layer]["rel_thresh"], atol=1e-6)

    print("KERNEL_OK")
</pallas_src>

<mosaic_0001>
module attributes {stable_mosaic.version = 11 : i64} {
  func.func @fused_synapse_neuron_kernel(%arg0: i32, %arg1: i32, %arg2: memref<8x128xf32, #tpu.memory_space<vmem>>, %arg3: memref<128x128xf32, #tpu.memory_space<vmem>>, %arg4: memref<1x128xf32, #tpu.memory_space<vmem>>, %arg5: memref<8x128xf32, #tpu.memory_space<vmem>>, %arg6: memref<8x128xf32, #tpu.memory_space<vmem>>, %arg7: memref<8x128xf32, #tpu.memory_space<vmem>>, %arg8: memref<8x128xf32, #tpu.memory_space<vmem>>, %arg9: memref<8x128xf32, #tpu.memory_space<vmem>>, %arg10: memref<8x128xf32, #tpu.memory_space<vmem>>, %arg11: memref<8x128xf32, #tpu.memory_space<vmem>>) attributes {dimension_semantics = [#tpu.dimension_semantics<parallel>, #tpu.dimension_semantics<arbitrary>], iteration_bounds = array<i64: 1, 1>, scalar_prefetch = 0 : i64, scratch_operands = 1 : i64, tpu.core_type = #tpu.core_type<tc>, window_params = [{transform_indices = @transform_0, window_bounds = array<i64: 8, 128>}, {transform_indices = @transform_1, window_bounds = array<i64: 128, 128>}, {transform_indices = @transform_2, window_bounds = array<i64: 1, 128>}, {transform_indices = @transform_3, window_bounds = array<i64: 8, 128>}, {transform_indices = @transform_4, window_bounds = array<i64: 8, 128>}, {transform_indices = @transform_5, window_bounds = array<i64: 8, 128>}, {transform_indices = @transform_6, window_bounds = array<i64: 8, 128>}, {transform_indices = @transform_7, window_bounds = array<i64: 8, 128>}, {transform_indices = @transform_8, window_bounds = array<i64: 8, 128>}]} {
    %c0_i32 = arith.constant 0 : i32
    %0 = arith.cmpi eq, %arg1, %c0_i32 : i32
    %1 = arith.extui %0 : i1 to i32
    %c0_i32_0 = arith.constant 0 : i32
    %2 = arith.cmpi ne, %1, %c0_i32_0 : i32
    scf.if %2 {
      %cst_10 = arith.constant 0.000000e+00 : f32
      %12 = vector.broadcast %cst_10 : f32 to vector<8x128xf32>
      %c0_11 = arith.constant 0 : index
      %c0_12 = arith.constant 0 : index
      %13 = vector.load %arg11[%c0_11, %c0_12] : memref<8x128xf32, #tpu.memory_space<vmem>>, vector<8x128xf32>
      tpu.vector_store %arg11[%c0_11, %c0_12], %12 {strides = array<i32>} : memref<8x128xf32, #tpu.memory_space<vmem>>, vector<8x128xf32>,
    } else {
    }
    %c0 = arith.constant 0 : index
    %c0_1 = arith.constant 0 : index
    %3 = vector.load %arg11[%c0, %c0_1] : memref<8x128xf32, #tpu.memory_space<vmem>>, vector<8x128xf32>
    %c0_2 = arith.constant 0 : index
    %c0_3 = arith.constant 0 : index
    %4 = vector.load %arg2[%c0_2, %c0_3] : memref<8x128xf32, #tpu.memory_space<vmem>>, vector<8x128xf32>
    %c0_4 = arith.constant 0 : index
    %c0_5 = arith.constant 0 : index
    %5 = vector.load %arg3[%c0_4, %c0_5] : memref<128x128xf32, #tpu.memory_space<vmem>>, vector<128x128xf32>
    %cst = arith.constant dense<0.000000e+00> : vector<8x128xf32>
    %6 = tpu.matmul %4, %5, %cst {dimension_numbers = #tpu.dot_dimension_numbers<[1], [0], [0], [1], [0, 0, 1, 1], [], []>} : vector<8x128xf32>, vector<128x128xf32>, vector<8x128xf32> -> vector<8x128xf32>
    %7 = arith.addf %3, %6 : vector<8x128xf32>
    %c0_6 = arith.constant 0 : index
    %c0_7 = arith.constant 0 : index
    %8 = vector.load %arg11[%c0_6, %c0_7] : memref<8x128xf32, #tpu.memory_space<vmem>>, vector<8x128xf32>
    tpu.vector_store %arg11[%c0_6, %c0_7], %7 {strides = array<i32>} : memref<8x128xf32, #tpu.memory_space<vmem>>, vector<8x128xf32>,
    %c0_i32_8 = arith.constant 0 : i32
    %9 = arith.cmpi eq, %arg1, %c0_i32_8 : i32
    %10 = arith.extui %9 : i1 to i32
    %c0_i32_9 = arith.constant 0 : i32
    %11 = arith.cmpi ne, %10, %c0_i32_9 : i32
    scf.if %11 {
      %c0_10 = arith.constant 0 : index
      %c0_11 = arith.constant 0 : index
      %12 = vector.load %arg11[%c0_10, %c0_11] : memref<8x128xf32, #tpu.memory_space<vmem>>, vector<8x128xf32>
      %c0_12 = arith.constant 0 : index
      %c0_13 = arith.constant 0 : index
      %13 = vector.load %arg4[%c0_12, %c0_13] : memref<1x128xf32, #tpu.memory_space<vmem>>, vector<1x128xf32>
      %14 = vector.broadcast %13 : vector<1x128xf32> to vector<8x128xf32>
      %15 = arith.addf %12, %14 : vector<8x128xf32>
      %c0_14 = arith.constant 0 : index
      %c0_15 = arith.constant 0 : index
      %16 = vector.load %arg5[%c0_14, %c0_15] : memref<8x128xf32, #tpu.memory_space<vmem>>, vector<8x128xf32>
      %c0_16 = arith.constant 0 : index
      %c0_17 = arith.constant 0 : index
      %17 = vector.load %arg6[%c0_16, %c0_17] : memref<8x128xf32, #tpu.memory_space<vmem>>, vector<8x128xf32>
      %c0_18 = arith.constant 0 : index
      %c0_19 = arith.constant 0 : index
      %18 = vector.load %arg7[%c0_18, %c0_19] : memref<8x128xf32, #tpu.memory_space<vmem>>, vector<8x128xf32>
      %cst_20 = arith.constant 0.949999988 : f32
      %19 = vector.broadcast %cst_20 : f32 to vector<8x128xf32>
      %20 = arith.mulf %19, %18 : vector<8x128xf32>
      %cst_21 = arith.constant 5.000000e-02 : f32
      %21 = vector.broadcast %cst_21 : f32 to vector<8x128xf32>
      %22 = arith.mulf %21, %17 : vector<8x128xf32>
      %23 = arith.addf %20, %22 : vector<8x128xf32>
      %cst_22 = arith.constant 3.000000e-01 : f32
      %24 = vector.broadcast %cst_22 : f32 to vector<8x128xf32>
      %25 = arith.mulf %23, %24 : vector<8x128xf32>
      %cst_23 = arith.constant 1.000000e+00 : f32
      %26 = vector.broadcast %cst_23 : f32 to vector<8x128xf32>
      %27 = arith.addf %26, %25 : vector<8x128xf32>
      %cst_24 = arith.constant 0.899999976 : f32
      %28 = vector.broadcast %cst_24 : f32 to vector<8x128xf32>
      %29 = arith.mulf %28, %16 : vector<8x128xf32>
      %cst_25 = arith.constant 0.4358899 : f32
      %30 = vector.broadcast %cst_25 : f32 to vector<8x128xf32>
      %31 = arith.mulf %30, %15 : vector<8x128xf32>
      %32 = arith.addf %29, %31 : vector<8x128xf32>
      %33 = arith.mulf %17, %27 : vector<8x128xf32>
      %34 = arith.subf %32, %33 : vector<8x128xf32>
      %35 = arith.cmpf ogt, %16, %27 : vector<8x128xf32>
      %36 = arith.extui %35 : vector<8x128xi1> to vector<8x128xi32>
      %37 = arith.sitofp %36 : vector<8x128xi32> to vector<8x128xf32>
      %c0_26 = arith.constant 0 : index
      %c0_27 = arith.constant 0 : index
      %38 = vector.load %arg8[%c0_26, %c0_27] : memref<8x128xf32, #tpu.memory_space<vmem>>, vector<8x128xf32>
      tpu.vector_store %arg8[%c0_26, %c0_27], %37 {strides = array<i32>} : memref<8x128xf32, #tpu.memory_space<vmem>>, vector<8x128xf32>,
      %c0_28 = arith.constant 0 : index
      %c0_29 = arith.constant 0 : index
      %39 = vector.load %arg9[%c0_28, %c0_29] : memref<8x128xf32, #tpu.memory_space<vmem>>, vector<8x128xf32>
      tpu.vector_store %arg9[%c0_28, %c0_29], %34 {strides = array<i32>} : memref<8x128xf32, #tpu.memory_space<vmem>>, vector<8x128xf32>,
      %c0_30 = arith.constant 0 : index
      %c0_31 = arith.constant 0 : index
      %40 = vector.load %arg10[%c0_30, %c0_31] : memref<8x128xf32, #tpu.memory_space<vmem>>, vector<8x128xf32>
      tpu.vector_store %arg10[%c0_30, %c0_31], %23 {strides = array<i32>} : memref<8x128xf32, #tpu.memory_space<vmem>>, vector<8x128xf32>,
    } else {
    }
    return
  }
  func.func @transform_0(%arg0: i32, %arg1: i32) -> (i32, i32) {
    %c0_i32 = arith.constant 0 : i32
    %c0_i32_0 = arith.constant 0 : i32
    return %c0_i32, %arg1 : i32, i32
  }
  func.func @transform_1(%arg0: i32, %arg1: i32) -> (i32, i32) {
    %c0_i32 = arith.constant 0 : i32
    return %arg1, %arg0 : i32, i32
  }
  func.func @transform_2(%arg0: i32, %arg1: i32) -> (i32, i32) {
    %c0_i32 = arith.constant 0 : i32
    %c0_i32_0 = arith.constant 0 : i32
    return %c0_i32, %arg0 : i32, i32
  }
  func.func @transform_3(%arg0: i32, %arg1: i32) -> (i32, i32) {
    %c0_i32 = arith.constant 0 : i32
    %c0_i32_0 = arith.constant 0 : i32
    return %c0_i32, %arg0 : i32, i32
  }
  func.func @transform_4(%arg0: i32, %arg1: i32) -> (i32, i32) {
    %c0_i32 = arith.constant 0 : i32
    %c0_i32_0 = arith.constant 0 : i32
    return %c0_i32, %arg0 : i32, i32
  }
  func.func @transform_5(%arg0: i32, %arg1: i32) -> (i32, i32) {
    %c0_i32 = arith.constant 0 : i32
    %c0_i32_0 = arith.constant 0 : i32
    return %c0_i32, %arg0 : i32, i32
  }
  func.func @transform_6(%arg0: i32, %arg1: i32) -> (i32, i32) {
    %c0_i32 = arith.constant 0 : i32
    %c0_i32_0 = arith.constant 0 : i32
    return %c0_i32, %arg0 : i32, i32
  }
  func.func @transform_7(%arg0: i32, %arg1: i32) -> (i32, i32) {
    %c0_i32 = arith.constant 0 : i32
    %c0_i32_0 = arith.constant 0 : i32
    return %c0_i32, %arg0 : i32, i32
  }
  func.func @transform_8(%arg0: i32, %arg1: i32) -> (i32, i32) {
    %c0_i32 = arith.constant 0 : i32
    %c0_i32_0 = arith.constant 0 : i32
    return %c0_i32, %arg0 : i32, i32
  }
}

</mosaic_0001>

<bundles_post_ra>
// kernel: network_forward.3
= control target key start
LH: loop header
LB: loop body
LE: loop exit
PB: predicated region body
PF: predicated region fallthrough
CT: control target
= control target key end

     0   :  { %v245_v0 = vmov 0.0|0.0   ;;  %vm246_vm0 = vmmov 0   ;;  %v247_v4 = vmov 0.0   ;;  %s365_s1 = inlined_call_operand.vmem [shape: f32[128,128], index: 1, kind: input, shape index: {}]   ;;  %s366_s4 = inlined_call_operand.vmem [shape: f32[8,128], index: 4, kind: input, shape index: {}, may-alias: {4,6}]   ;;  %s367_s5 = inlined_call_operand.vmem [shape: f32[8,128], index: 5, kind: input, shape index: {}, may-alias: {5,8}]   ;;  %s368_s8 = inlined_call_operand.vmem [shape: f32[8,128], index: 8, kind: output, shape index: {2}, may-alias: {5,8}]   ;;  %s369_s3 = inlined_call_operand.vmem [shape: f32[8,128], index: 3, kind: input, shape index: {}, may-alias: {3,7}]   ;;  %s370_s6 = inlined_call_operand.vmem [shape: f32[8,128], index: 6, kind: output, shape index: {0}, may-alias: {4,6}]   ;;  %s371_s0 = inlined_call_operand.vmem [shape: f32[8,128], index: 0, kind: input, shape index: {}]   ;;  %s372_s2 = inlined_call_operand.vmem [shape: f32[1,128], index: 2, kind: input, shape index: {}]   ;;  %s373_s7 = inlined_call_operand.vmem [shape: f32[8,128], index: 7, kind: output, shape index: {1}, may-alias: {3,7}]  }
   0x1   :  { %218 = vmatprep.subr.bf16.mxu0 %v245_v0  ;;  %v33_v1 = vld [vmem:[%s365_s1] sm:$0xff]  ;;  %v34_v2 = vld [vmem:[%s365_s1 + $0x8] sm:$0xff]  ;;  %v35_v3 = vld [vmem:[%s365_s1 + $0x10] sm:$0xff]  ;;  %215 = vmatprep.mubr.msk.f32.mxu0 %vm246_vm0, %v247_v4 }
   0x2   :  { %v219_v5 = vpack.c.bf16 %v34_v2, %v33_v1  ;;  %v36_v6 = vld [vmem:[%s365_s1 + $0x18] sm:$0xff]  ;;  %v37_v8 = vld [vmem:[%s365_s1 + $0x20] sm:$0xff]  ;;  %v38_v9 = vld [vmem:[%s365_s1 + $0x28] sm:$0xff] }
   0x3   :  { %v222_v7 = vpack.c.bf16 %v36_v6, %v35_v3  ;;  %v134_v10 = vld [vmem:[%s366_s4] sm:$0xff]  ;;  %v225_v13 = vpack.c.bf16 %v38_v9, %v37_v8  ;;  %v39_v15 = vld [vmem:[%s365_s1 + $0x30] sm:$0xff]  ;;  %v40_v16 = vld [vmem:[%s365_s1 + $0x38] sm:$0xff] }
   0x4   :  { %220 = vmatpush3.bf16.msra.mxu0 %v219_v5  ;;  %v135_v11 = vld [vmem:[%s367_s5] sm:$0xff]  ;;  %v137_v12 = vmul.f32 0.05, %v134_v10  ;;  %v228_v18 = vpack.c.bf16 %v40_v16, %v39_v15  ;;  %v42_v21 = vld [vmem:[%s365_s1 + $0x48] sm:$0xff]  ;;  %v43_v26 = vld [vmem:[%s365_s1 + $0x50] sm:$0xff] }
   0x5   :  { %221 = vmatprep.subr.bf16.mxu0 %v245_v0  ;;  %v136_v14 = vmul.f32 0.95, %v135_v11  ;;  %v41_v20 = vld [vmem:[%s365_s1 + $0x40] sm:$0xff]  ;;  %v44_v27 = vld [vmem:[%s365_s1 + $0x58] sm:$0xff]  ;;  %v46_v31 = vld [vmem:[%s365_s1 + $0x68] sm:$0xff] }
   0x6   :  { %v133_v23 = vld [vmem:[%s369_s3] sm:$0xff]  ;;  %v231_v24 = vpack.c.bf16 %v42_v21, %v41_v20  ;;  %v234_v29 = vpack.c.bf16 %v44_v27, %v43_v26  ;;  %v47_v33 = vld [vmem:[%s365_s1 + $0x70] sm:$0xff]  ;;  %v48_v34 = vld [vmem:[%s365_s1 + $0x78] sm:$0xff] }
   0x7   :  { %v138_v17 = vadd.f32 %v137_v12, %v136_v14  ;;  %v45_v30 = vld [vmem:[%s365_s1 + $0x60] sm:$0xff]  ;;  %v240_v35 = vpack.c.bf16 %v48_v34, %v47_v33  ;;  %v141_v40 = vmul.f32 0.9, %v133_v23 }
   0x8   :  { %223 = vmatpush3.bf16.msra.mxu0 %v222_v7  ;;  %v237_v32 = vpack.c.bf16 %v46_v31, %v45_v30  ;;  %v32_v36 = vld [vmem:[%s371_s0] sm:$0xff] }
   0x9   :  { %224 = vmatprep.subr.bf16.mxu0 %v245_v0  ;;  %v139_v19 = vmul.f32 0.3, %v138_v17  ;;  %151 = vst [vmem:[%s368_s8] sm:$0xff] %v138_v17  ;;  %v164_v37 = vld [vmem:[%s372_s2] ss:$0 sm:$0xff] }
   0xb   :  { %v140_v22 = vadd.f32 1.0, %v139_v19 }
   0xc   :  { %226 = vmatpush3.bf16.msra.mxu0 %v225_v13 }
   0xd   :  { %227 = vmatprep.subr.bf16.mxu0 %v245_v0  ;;  %v144_v25 = vmul.f32 %v140_v22, %v134_v10  ;;  %vm146_vm1 = vcmp.gt.f32.partialorder %v133_v23, %v140_v22 }
   0xe   :  { %v165_v28 = vsel %vm146_vm1, 1.0, %v247_v4 }
   0xf   :  { %149 = vst [vmem:[%s370_s6] sm:$0xff] %v165_v28 }
  0x10   :  { %229 = vmatpush3.bf16.msra.mxu0 %v228_v18 }
  0x11   :  { %230 = vmatprep.subr.bf16.mxu0 %v245_v0 }
  0x14   :  { %232 = vmatpush3.bf16.msra.mxu0 %v231_v24 }
  0x15   :  { %233 = vmatprep.subr.bf16.mxu0 %v245_v0 }
  0x18   :  { %235 = vmatpush3.bf16.msra.mxu0 %v234_v29 }
  0x19   :  { %236 = vmatprep.subr.bf16.mxu0 %v245_v0 }
  0x1c   :  { %238 = vmatpush3.bf16.msra.mxu0 %v237_v32 }
  0x1d   :  { %239 = vmatprep.subr.bf16.mxu0 %v245_v0 }
  0x20   :  { %241 = vmatpush3.bf16.msra.mxu0 %v240_v35 }
  0x23   :  { %216 = vmatmul.mubr.f32.vlgmr.msra.gmra.mrb[0].mxu0 %v32_v36 }
  0xf6   :  { %v115_v38 = vpop.f32.mrb[0].mxu0 }
  0xf7   :  { %v132_v39 = vadd.f32 %v164_v37, %v115_v38  ;;  %v217_v41 = vpop.f32.mrb[1].mxu0 }
  0xf9   :  { %v142_v42 = vmul.f32 0.4358899, %v132_v39 }
  0xfb   :  { %v143_v43 = vadd.f32 %v142_v42, %v141_v40 }
  0xfd   :  { %v145_v44 = vsub.f32 %v143_v43, %v144_v25 }
  0xff   :  { %150 = vst [vmem:[%s373_s7] sm:$0xff] %v145_v44 }

</bundles_post_ra>
